<compile_context>
chip_gen: v6e
topology: v6e:2x2x1
jax: 0.10.0
libtpu: 0.0.40
codegen_flags: <defaults>
</compile_context>

<pallas_src>
import jax
import jax.numpy as jnp
import numpy as np
from jax.experimental import pallas as pl
from jax.experimental.pallas import tpu as pltpu


def _reauc_block_kernel(m_ref, n_ref, a_ref, b_ref, alpha_ref, p_ref,
                        x_ref, y_ref, term_ref):
    """One block of `tb` tasks -> per-task objective terms (tb, 1)."""
    d = x_ref.shape[0]          # features
    nm = y_ref.shape[1]         # instances per task (static, no padding)

    # W_block = N_block @ M^T : (tb, d).  Small, well-shaped MXU matmul.
    w_blk = jax.lax.dot_general(
        n_ref[...], m_ref[...],
        dimension_numbers=(((1,), (1,)), ((), ())),
        preferred_element_type=jnp.float32,
        precision=jax.lax.Precision.HIGHEST)

    # Scores S[j, n] = sum_f W[j, f] * X[f, j, n], accumulated on the VPU as
    # d dense (tb, Nm) mul-adds; each x_ref[f] is a contiguous lane-dense tile
    # and w_blk[:, f:f+1] is a (tb, 1) column broadcast along the lanes.
    s = x_ref[0] * w_blk[:, 0:1]
    for f in range(1, d):
        s = s + x_ref[f] * w_blk[:, f:f + 1]           # (tb, Nm)

    y = y_ref[...]                                     # (tb, Nm), {0, 1}

    # Batched lane reductions: one per statistic for the whole task block.
    pos = jnp.sum(y, axis=1, keepdims=True)            # (tb, 1)
    sum_s = jnp.sum(s, axis=1, keepdims=True)
    lin_pos = jnp.sum(s * y, axis=1, keepdims=True)
    s2 = s * s
    sum_s2 = jnp.sum(s2, axis=1, keepdims=True)
    sum_s2y = jnp.sum(s2 * y, axis=1, keepdims=True)

    # NOTE: neg uses the static Nm, so Y/X must not be padded along Nm.
    neg = jnp.float32(nm) - pos
    lin_neg = sum_s - lin_pos
    pos_d = jnp.where(pos == 0.0, 1.0, pos)
    neg_d = jnp.where(neg == 0.0, 1.0, neg)

    a = a_ref[...]                                     # (tb, 1)
    b = b_ref[...]
    al = alpha_ref[...]
    p = p_ref[...]                                     # precomputed prefix p

    # sum((s-a)^2 y) and sum((s-b)^2 (1-y)) expanded into the reductions above.
    sq_a = sum_s2y - 2.0 * a * lin_pos + a * a * pos
    sq_b = (sum_s2 - sum_s2y) - 2.0 * b * lin_neg + b * b * neg

    term_ref[...] = ((1.0 - p) / pos_d * sq_a
                     + p / neg_d * sq_b
                     + 2.0 * (1.0 + al) * p / neg_d * lin_neg
                     - 2.0 * (1.0 + al) * (1.0 - p) / pos_d * lin_pos)


def _vmem_limit_bytes():
    """~3/4 of physical VMEM (64 MiB on v7x, 128 MiB on v5e/v6e), capped."""
    cap = 64 << 20
    try:
        cap = int(pltpu.get_tpu_info().vmem_capacity_bytes)
    except Exception:
        pass
    return int(min(max(cap, 32 << 20) * 3 // 4, 96 << 20))


def _pick_tasks_per_block(T, d, Nm, k, vmem_limit_bytes):
    """Largest multiple-of-8 divisor of T whose working set fits the budget."""
    headroom = 4 << 20                                  # compiler / internal scratch
    fixed = 2 * d * k * 4                               # double-buffered M block
    budget = max(vmem_limit_bytes - headroom - fixed, 1 << 20)
    per_task = (2 * (d * Nm + Nm + k + 4) * 4           # dbl-buffered X/Y/N/a,b,alpha,p/out
                + (2 * Nm + d) * 4)                     # in-kernel s, s^2, W temporaries
    max_tb = max(budget // per_task, 1)
    best = 0
    for tb in range(8, T + 1, 8):
        if T % tb == 0 and tb <= max_tb:
            best = tb
    if best == 0:
        # No multiple-of-8 divisor fits/exists: single block (block dim ==
        # full array dim satisfies the (8, 128) layout rule).
        best = T
    return int(best)


def reauc_forward(M, N, a, b, alpha, lam, X, Y, tasks_per_block=None):
    """Pallas reAUC.forward for T equal-length, stacked tasks.

    Layout contract (chosen so no host-side transpose of X is ever needed):
      M: (d, k)   N: (T, k)   a, b, alpha: (T, 1)
      X: (d, T, Nm) float32   -- X[:, i, :] is the module's X_i^T
      Y: (T, Nm)   float32 in {0, 1}
    """
    M = jnp.asarray(M, jnp.float32)
    N = jnp.asarray(N, jnp.float32)
    X = jnp.asarray(X, jnp.float32)
    Y = jnp.asarray(Y, jnp.float32)
    d, k = M.shape
    T = N.shape[0]
    dX, TX, Nm = X.shape
    assert (dX, TX) == (d, T) and Y.shape == (T, Nm)

    a = jnp.asarray(a, jnp.float32).reshape(T, 1)
    b = jnp.asarray(b, jnp.float32).reshape(T, 1)
    alpha = jnp.asarray(alpha, jnp.float32).reshape(T, 1)

    vmem_limit = _vmem_limit_bytes()
    tb = tasks_per_block
    if tb is None or T % tb != 0 or (tb % 8 != 0 and tb != T):
        tb = _pick_tasks_per_block(T, d, Nm, k, vmem_limit)
    num_blocks = T // tb

    # Prefix p depends only on Y: precompute it (cheap reduce, ~1/d of the X
    # traffic) so the grid axis has no sequential carry and can be parallel.
    pos_t = jnp.sum(Y, axis=1)                                        # (T,)
    cum_pos = jnp.cumsum(pos_t)
    total = jnp.arange(1, T + 1, dtype=jnp.float32) * jnp.float32(Nm)
    p_t = (cum_pos / total).reshape(T, 1)

    terms = pl.pallas_call(
        _reauc_block_kernel,
        out_shape=jax.ShapeDtypeStruct((T, 1), jnp.float32),
        grid_spec=pltpu.PrefetchScalarGridSpec(
            num_scalar_prefetch=0,
            grid=(num_blocks,),
            in_specs=[
                pl.BlockSpec((d, k), lambda g: (0, 0)),             # M (full)
                pl.BlockSpec((tb, k), lambda g: (g, 0)),            # N block
                pl.BlockSpec((tb, 1), lambda g: (g, 0)),            # a
                pl.BlockSpec((tb, 1), lambda g: (g, 0)),            # b
                pl.BlockSpec((tb, 1), lambda g: (g, 0)),            # alpha
                pl.BlockSpec((tb, 1), lambda g: (g, 0)),            # prefix p
                pl.BlockSpec((d, tb, Nm), lambda g: (0, g, 0)),     # X block
                pl.BlockSpec((tb, Nm), lambda g: (g, 0)),           # Y block
            ],
            out_specs=pl.BlockSpec((tb, 1), lambda g: (g, 0)),      # per-task terms
        ),
        compiler_params=pltpu.CompilerParams(
            dimension_semantics=("parallel",),
            vmem_limit_bytes=vmem_limit),
    )(M, N, a, b, alpha, p_t, X, Y)

    # Parameter-only finalization (O(T*d*k) flops) in plain JAX.
    p_last = p_t[T - 1, 0]
    W = jnp.dot(M, N.T, precision=jax.lax.Precision.HIGHEST)         # (d, T)
    obj = jnp.sum(terms) / jnp.float32(T)
    obj = obj - p_last * (1.0 - p_last) * jnp.sum(alpha * alpha)
    obj = obj + (lam / 2.0) * (jnp.sum(M * M) + jnp.sum(N * N))
    obj = obj - lam * jnp.sqrt(jnp.sum(W * W))
    return obj


def reauc_reference(M, N, a, b, alpha, lam, X, Y):
    """Pure-JAX mirror of the PyTorch forward (X given as (d, T, Nm))."""
    T = N.shape[0]
    W = jnp.dot(M, N.T, precision=jax.lax.Precision.HIGHEST)         # (d, T)
    obj = 0.0
    t_pos, t_neg, p = 0.0, 0.0, 0.0
    for i in range(T):
        Xi = X[:, i, :]             # (d, Nm) == module's X_i^T
        Yi = Y[i]                   # (Nm,)
        pos = float(jnp.sum(Yi))
        neg = float(jnp.sum(1.0 - Yi))
        t_pos += pos
        t_neg += neg
        p = t_pos / (t_pos + t_neg)
        pos_d = pos if pos != 0.0 else 1.0
        neg_d = neg if neg != 0.0 else 1.0
        s = jnp.dot(W[:, i], Xi, precision=jax.lax.Precision.HIGHEST)  # (Nm,)
        ai = float(a[i, 0]); bi = float(b[i, 0]); ali = float(alpha[i, 0])
        obj = obj + (1.0 - p) / pos_d * jnp.sum((s - ai) ** 2 * Yi)
        obj = obj + p / neg_d * jnp.sum((s - bi) ** 2 * (1.0 - Yi))
        obj = obj + 2.0 * (1.0 + ali) * p / neg_d * jnp.sum(s * (1.0 - Yi))
        obj = obj - 2.0 * (1.0 + ali) * (1.0 - p) / pos_d * jnp.sum(s * Yi)
    obj = obj / T
    obj = obj - p * (1.0 - p) * jnp.sum(alpha ** 2)
    obj = obj + lam / 2.0 * (jnp.sum(M ** 2) + jnp.sum(N ** 2))
    obj = obj - lam * jnp.linalg.norm(W)
    return obj


if __name__ == "__main__":
    # Small synthetic shapes: T tasks, Nm instances per task, d features, rank k.
    T, Nm, d, k = 16, 128, 32, 8
    lam = 0.1

    key = jax.random.PRNGKey(0)
    k1, k2, k3, k4, k5, k6, k7 = jax.random.split(key, 7)

    M = jax.random.normal(k1, (d, k), dtype=jnp.float32)
    N = jax.random.normal(k2, (T, k), dtype=jnp.float32)
    a = jax.random.normal(k3, (T, 1), dtype=jnp.float32)
    b = jax.random.normal(k4, (T, 1), dtype=jnp.float32)
    alpha = jax.random.normal(k5, (T, 1), dtype=jnp.float32)

    # X generated directly in the feature-major, lane-dense kernel layout
    # (no host transpose anywhere); Y is a dense (T, Nm) {0,1} matrix.
    X = jax.random.normal(k6, (d, T, Nm), dtype=jnp.float32)
    Y = jax.random.bernoulli(k7, 0.5, (T, Nm)).astype(jnp.float32)

    # tasks_per_block=8 -> grid=(2,) so the blocked / parallel path is exercised.
    out = reauc_forward(M, N, a, b, alpha, lam, X, Y, tasks_per_block=8)
    out = jax.block_until_ready(out)

    ref = reauc_reference(M, N, a, b, alpha, lam, X, Y)
    np.testing.assert_allclose(np.asarray(out), np.asarray(ref),
                               rtol=5e-3, atol=1e-2)

    print("KERNEL_OK")
</pallas_src>

<mosaic_0001>
module attributes {stable_mosaic.version = 11 : i64} {
  func.func @_reauc_block_kernel(%arg0: i32, %arg1: memref<32x8xf32, #tpu.memory_space<vmem>>, %arg2: memref<8x8xf32, #tpu.memory_space<vmem>>, %arg3: memref<8x1xf32, #tpu.memory_space<vmem>>, %arg4: memref<8x1xf32, #tpu.memory_space<vmem>>, %arg5: memref<8x1xf32, #tpu.memory_space<vmem>>, %arg6: memref<8x1xf32, #tpu.memory_space<vmem>>, %arg7: memref<32x8x128xf32, #tpu.memory_space<vmem>>, %arg8: memref<8x128xf32, #tpu.memory_space<vmem>>, %arg9: memref<8x1xf32, #tpu.memory_space<vmem>>) attributes {dimension_semantics = [#tpu.dimension_semantics<parallel>], iteration_bounds = array<i64: 2>, scalar_prefetch = 0 : i64, scratch_operands = 0 : i64, tpu.core_type = #tpu.core_type<tc>, window_params = [{pipeline_mode = #tpu.pipeline_mode<synchronous>, transform_indices = @transform_0, window_bounds = array<i64: 32, 8>}, {transform_indices = @transform_1, window_bounds = array<i64: 8, 8>}, {transform_indices = @transform_2, window_bounds = array<i64: 8, 1>}, {transform_indices = @transform_3, window_bounds = array<i64: 8, 1>}, {transform_indices = @transform_4, window_bounds = array<i64: 8, 1>}, {transform_indices = @transform_5, window_bounds = array<i64: 8, 1>}, {transform_indices = @transform_6, window_bounds = array<i64: 32, 8, 128>}, {transform_indices = @transform_7, window_bounds = array<i64: 8, 128>}, {transform_indices = @transform_8, window_bounds = array<i64: 8, 1>}]} {
    %c0 = arith.constant 0 : index
    %c0_0 = arith.constant 0 : index
    %0 = vector.load %arg2[%c0, %c0_0] : memref<8x8xf32, #tpu.memory_space<vmem>>, vector<8x8xf32>
    %c0_1 = arith.constant 0 : index
    %c0_2 = arith.constant 0 : index
    %1 = vector.load %arg1[%c0_1, %c0_2] : memref<32x8xf32, #tpu.memory_space<vmem>>, vector<32x8xf32>
    %cst = arith.constant dense<0.000000e+00> : vector<8x32xf32>
    %2 = tpu.matmul %0, %1, %cst {dimension_numbers = #tpu.dot_dimension_numbers<[1], [1], [0], [0], [0, 0, 1, 0], [], []>, precision = #tpu.contract_precision<fp32>} : vector<8x8xf32>, vector<32x8xf32>, vector<8x32xf32> -> vector<8x32xf32>
    %c0_3 = arith.constant 0 : index
    %c0_4 = arith.constant 0 : index
    %c0_5 = arith.constant 0 : index
    %3 = vector.load %arg7[%c0_3, %c0_4, %c0_5] : memref<32x8x128xf32, #tpu.memory_space<vmem>>, vector<1x8x128xf32>
    %4 = vector.shape_cast %3 : vector<1x8x128xf32> to vector<8x128xf32>
    %5 = vector.extract_strided_slice %2 {offsets = [0, 0], sizes = [8, 1], strides = [1, 1]} : vector<8x32xf32> to vector<8x1xf32>
    %6 = vector.broadcast %5 : vector<8x1xf32> to vector<8x128xf32>
    %7 = arith.mulf %4, %6 : vector<8x128xf32>
    %c1 = arith.constant 1 : index
    %c0_6 = arith.constant 0 : index
    %c0_7 = arith.constant 0 : index
    %8 = vector.load %arg7[%c1, %c0_6, %c0_7] : memref<32x8x128xf32, #tpu.memory_space<vmem>>, vector<1x8x128xf32>
    %9 = vector.shape_cast %8 : vector<1x8x128xf32> to vector<8x128xf32>
    %10 = vector.extract_strided_slice %2 {offsets = [0, 1], sizes = [8, 1], strides = [1, 1]} : vector<8x32xf32> to vector<8x1xf32>
    %11 = vector.broadcast %10 : vector<8x1xf32> to vector<8x128xf32>
    %12 = arith.mulf %9, %11 : vector<8x128xf32>
    %13 = arith.addf %7, %12 : vector<8x128xf32>
    %c2 = arith.constant 2 : index
    %c0_8 = arith.constant 0 : index
    %c0_9 = arith.constant 0 : index
    %14 = vector.load %arg7[%c2, %c0_8, %c0_9] : memref<32x8x128xf32, #tpu.memory_space<vmem>>, vector<1x8x128xf32>
    %15 = vector.shape_cast %14 : vector<1x8x128xf32> to vector<8x128xf32>
    %16 = vector.extract_strided_slice %2 {offsets = [0, 2], sizes = [8, 1], strides = [1, 1]} : vector<8x32xf32> to vector<8x1xf32>
    %17 = vector.broadcast %16 : vector<8x1xf32> to vector<8x128xf32>
    %18 = arith.mulf %15, %17 : vector<8x128xf32>
    %19 = arith.addf %13, %18 : vector<8x128xf32>
    %c3 = arith.constant 3 : index
    %c0_10 = arith.constant 0 : index
    %c0_11 = arith.constant 0 : index
    %20 = vector.load %arg7[%c3, %c0_10, %c0_11] : memref<32x8x128xf32, #tpu.memory_space<vmem>>, vector<1x8x128xf32>
    %21 = vector.shape_cast %20 : vector<1x8x128xf32> to vector<8x128xf32>
    %22 = vector.extract_strided_slice %2 {offsets = [0, 3], sizes = [8, 1], strides = [1, 1]} : vector<8x32xf32> to vector<8x1xf32>
    %23 = vector.broadcast %22 : vector<8x1xf32> to vector<8x128xf32>
    %24 = arith.mulf %21, %23 : vector<8x128xf32>
    %25 = arith.addf %19, %24 : vector<8x128xf32>
    %c4 = arith.constant 4 : index
    %c0_12 = arith.constant 0 : index
    %c0_13 = arith.constant 0 : index
    %26 = vector.load %arg7[%c4, %c0_12, %c0_13] : memref<32x8x128xf32, #tpu.memory_space<vmem>>, vector<1x8x128xf32>
    %27 = vector.shape_cast %26 : vector<1x8x128xf32> to vector<8x128xf32>
    %28 = vector.extract_strided_slice %2 {offsets = [0, 4], sizes = [8, 1], strides = [1, 1]} : vector<8x32xf32> to vector<8x1xf32>
    %29 = vector.broadcast %28 : vector<8x1xf32> to vector<8x128xf32>
    %30 = arith.mulf %27, %29 : vector<8x128xf32>
    %31 = arith.addf %25, %30 : vector<8x128xf32>
    %c5 = arith.constant 5 : index
    %c0_14 = arith.constant 0 : index
    %c0_15 = arith.constant 0 : index
    %32 = vector.load %arg7[%c5, %c0_14, %c0_15] : memref<32x8x128xf32, #tpu.memory_space<vmem>>, vector<1x8x128xf32>
    %33 = vector.shape_cast %32 : vector<1x8x128xf32> to vector<8x128xf32>
    %34 = vector.extract_strided_slice %2 {offsets = [0, 5], sizes = [8, 1], strides = [1, 1]} : vector<8x32xf32> to vector<8x1xf32>
    %35 = vector.broadcast %34 : vector<8x1xf32> to vector<8x128xf32>
    %36 = arith.mulf %33, %35 : vector<8x128xf32>
    %37 = arith.addf %31, %36 : vector<8x128xf32>
    %c6 = arith.constant 6 : index
    %c0_16 = arith.constant 0 : index
    %c0_17 = arith.constant 0 : index
    %38 = vector.load %arg7[%c6, %c0_16, %c0_17] : memref<32x8x128xf32, #tpu.memory_space<vmem>>, vector<1x8x128xf32>
    %39 = vector.shape_cast %38 : vector<1x8x128xf32> to vector<8x128xf32>
    %40 = vector.extract_strided_slice %2 {offsets = [0, 6], sizes = [8, 1], strides = [1, 1]} : vector<8x32xf32> to vector<8x1xf32>
    %41 = vector.broadcast %40 : vector<8x1xf32> to vector<8x128xf32>
    %42 = arith.mulf %39, %41 : vector<8x128xf32>
    %43 = arith.addf %37, %42 : vector<8x128xf32>
    %c7 = arith.constant 7 : index
    %c0_18 = arith.constant 0 : index
    %c0_19 = arith.constant 0 : index
    %44 = vector.load %arg7[%c7, %c0_18, %c0_19] : memref<32x8x128xf32, #tpu.memory_space<vmem>>, vector<1x8x128xf32>
    %45 = vector.shape_cast %44 : vector<1x8x128xf32> to vector<8x128xf32>
    %46 = vector.extract_strided_slice %2 {offsets = [0, 7], sizes = [8, 1], strides = [1, 1]} : vector<8x32xf32> to vector<8x1xf32>
    %47 = vector.broadcast %46 : vector<8x1xf32> to vector<8x128xf32>
    %48 = arith.mulf %45, %47 : vector<8x128xf32>
    %49 = arith.addf %43, %48 : vector<8x128xf32>
    %c8 = arith.constant 8 : index
    %c0_20 = arith.constant 0 : index
    %c0_21 = arith.constant 0 : index
    %50 = vector.load %arg7[%c8, %c0_20, %c0_21] : memref<32x8x128xf32, #tpu.memory_space<vmem>>, vector<1x8x128xf32>
    %51 = vector.shape_cast %50 : vector<1x8x128xf32> to vector<8x128xf32>
    %52 = vector.extract_strided_slice %2 {offsets = [0, 8], sizes = [8, 1], strides = [1, 1]} : vector<8x32xf32> to vector<8x1xf32>
    %53 = vector.broadcast %52 : vector<8x1xf32> to vector<8x128xf32>
    %54 = arith.mulf %51, %53 : vector<8x128xf32>
    %55 = arith.addf %49, %54 : vector<8x128xf32>
    %c9 = arith.constant 9 : index
    %c0_22 = arith.constant 0 : index
    %c0_23 = arith.constant 0 : index
    %56 = vector.load %arg7[%c9, %c0_22, %c0_23] : memref<32x8x128xf32, #tpu.memory_space<vmem>>, vector<1x8x128xf32>
    %57 = vector.shape_cast %56 : vector<1x8x128xf32> to vector<8x128xf32>
    %58 = vector.extract_strided_slice %2 {offsets = [0, 9], sizes = [8, 1], strides = [1, 1]} : vector<8x32xf32> to vector<8x1xf32>
    %59 = vector.broadcast %58 : vector<8x1xf32> to vector<8x128xf32>
    %60 = arith.mulf %57, %59 : vector<8x128xf32>
    %61 = arith.addf %55, %60 : vector<8x128xf32>
    %c10 = arith.constant 10 : index
    %c0_24 = arith.constant 0 : index
    %c0_25 = arith.constant 0 : index
    %62 = vector.load %arg7[%c10, %c0_24, %c0_25] : memref<32x8x128xf32, #tpu.memory_space<vmem>>, vector<1x8x128xf32>
    %63 = vector.shape_cast %62 : vector<1x8x128xf32> to vector<8x128xf32>
    %64 = vector.extract_strided_slice %2 {offsets = [0, 10], sizes = [8, 1], strides = [1, 1]} : vector<8x32xf32> to vector<8x1xf32>
    %65 = vector.broadcast %64 : vector<8x1xf32> to vector<8x128xf32>
    %66 = arith.mulf %63, %65 : vector<8x128xf32>
    %67 = arith.addf %61, %66 : vector<8x128xf32>
    %c11 = arith.constant 11 : index
    %c0_26 = arith.constant 0 : index
    %c0_27 = arith.constant 0 : index
    %68 = vector.load %arg7[%c11, %c0_26, %c0_27] : memref<32x8x128xf32, #tpu.memory_space<vmem>>, vector<1x8x128xf32>
    %69 = vector.shape_cast %68 : vector<1x8x128xf32> to vector<8x128xf32>
    %70 = vector.extract_strided_slice %2 {offsets = [0, 11], sizes = [8, 1], strides = [1, 1]} : vector<8x32xf32> to vector<8x1xf32>
    %71 = vector.broadcast %70 : vector<8x1xf32> to vector<8x128xf32>
    %72 = arith.mulf %69, %71 : vector<8x128xf32>
    %73 = arith.addf %67, %72 : vector<8x128xf32>
    %c12 = arith.constant 12 : index
    %c0_28 = arith.constant 0 : index
    %c0_29 = arith.constant 0 : index
    %74 = vector.load %arg7[%c12, %c0_28, %c0_29] : memref<32x8x128xf32, #tpu.memory_space<vmem>>, vector<1x8x128xf32>
    %75 = vector.shape_cast %74 : vector<1x8x128xf32> to vector<8x128xf32>
    %76 = vector.extract_strided_slice %2 {offsets = [0, 12], sizes = [8, 1], strides = [1, 1]} : vector<8x32xf32> to vector<8x1xf32>
    %77 = vector.broadcast %76 : vector<8x1xf32> to vector<8x128xf32>
    %78 = arith.mulf %75, %77 : vector<8x128xf32>
    %79 = arith.addf %73, %78 : vector<8x128xf32>
    %c13 = arith.constant 13 : index
    %c0_30 = arith.constant 0 : index
    %c0_31 = arith.constant 0 : index
    %80 = vector.load %arg7[%c13, %c0_30, %c0_31] : memref<32x8x128xf32, #tpu.memory_space<vmem>>, vector<1x8x128xf32>
    %81 = vector.shape_cast %80 : vector<1x8x128xf32> to vector<8x128xf32>
    %82 = vector.extract_strided_slice %2 {offsets = [0, 13], sizes = [8, 1], strides = [1, 1]} : vector<8x32xf32> to vector<8x1xf32>
    %83 = vector.broadcast %82 : vector<8x1xf32> to vector<8x128xf32>
    %84 = arith.mulf %81, %83 : vector<8x128xf32>
    %85 = arith.addf %79, %84 : vector<8x128xf32>
    %c14 = arith.constant 14 : index
    %c0_32 = arith.constant 0 : index
    %c0_33 = arith.constant 0 : index
    %86 = vector.load %arg7[%c14, %c0_32, %c0_33] : memref<32x8x128xf32, #tpu.memory_space<vmem>>, vector<1x8x128xf32>
    %87 = vector.shape_cast %86 : vector<1x8x128xf32> to vector<8x128xf32>
    %88 = vector.extract_strided_slice %2 {offsets = [0, 14], sizes = [8, 1], strides = [1, 1]} : vector<8x32xf32> to vector<8x1xf32>
    %89 = vector.broadcast %88 : vector<8x1xf32> to vector<8x128xf32>
    %90 = arith.mulf %87, %89 : vector<8x128xf32>
    %91 = arith.addf %85, %90 : vector<8x128xf32>
    %c15 = arith.constant 15 : index
    %c0_34 = arith.constant 0 : index
    %c0_35 = arith.constant 0 : index
    %92 = vector.load %arg7[%c15, %c0_34, %c0_35] : memref<32x8x128xf32, #tpu.memory_space<vmem>>, vector<1x8x128xf32>
    %93 = vector.shape_cast %92 : vector<1x8x128xf32> to vector<8x128xf32>
    %94 = vector.extract_strided_slice %2 {offsets = [0, 15], sizes = [8, 1], strides = [1, 1]} : vector<8x32xf32> to vector<8x1xf32>
    %95 = vector.broadcast %94 : vector<8x1xf32> to vector<8x128xf32>
    %96 = arith.mulf %93, %95 : vector<8x128xf32>
    %97 = arith.addf %91, %96 : vector<8x128xf32>
    %c16 = arith.constant 16 : index
    %c0_36 = arith.constant 0 : index
    %c0_37 = arith.constant 0 : index
    %98 = vector.load %arg7[%c16, %c0_36, %c0_37] : memref<32x8x128xf32, #tpu.memory_space<vmem>>, vector<1x8x128xf32>
    %99 = vector.shape_cast %98 : vector<1x8x128xf32> to vector<8x128xf32>
    %100 = vector.extract_strided_slice %2 {offsets = [0, 16], sizes = [8, 1], strides = [1, 1]} : vector<8x32xf32> to vector<8x1xf32>
    %101 = vector.broadcast %100 : vector<8x1xf32> to vector<8x128xf32>
    %102 = arith.mulf %99, %101 : vector<8x128xf32>
    %103 = arith.addf %97, %102 : vector<8x128xf32>
    %c17 = arith.constant 17 : index
    %c0_38 = arith.constant 0 : index
    %c0_39 = arith.constant 0 : index
    %104 = vector.load %arg7[%c17, %c0_38, %c0_39] : memref<32x8x128xf32, #tpu.memory_space<vmem>>, vector<1x8x128xf32>
    %105 = vector.shape_cast %104 : vector<1x8x128xf32> to vector<8x128xf32>
    %106 = vector.extract_strided_slice %2 {offsets = [0, 17], sizes = [8, 1], strides = [1, 1]} : vector<8x32xf32> to vector<8x1xf32>
    %107 = vector.broadcast %106 : vector<8x1xf32> to vector<8x128xf32>
    %108 = arith.mulf %105, %107 : vector<8x128xf32>
    %109 = arith.addf %103, %108 : vector<8x128xf32>
    %c18 = arith.constant 18 : index
    %c0_40 = arith.constant 0 : index
    %c0_41 = arith.constant 0 : index
    %110 = vector.load %arg7[%c18, %c0_40, %c0_41] : memref<32x8x128xf32, #tpu.memory_space<vmem>>, vector<1x8x128xf32>
    %111 = vector.shape_cast %110 : vector<1x8x128xf32> to vector<8x128xf32>
    %112 = vector.extract_strided_slice %2 {offsets = [0, 18], sizes = [8, 1], strides = [1, 1]} : vector<8x32xf32> to vector<8x1xf32>
    %113 = vector.broadcast %112 : vector<8x1xf32> to vector<8x128xf32>
    %114 = arith.mulf %111, %113 : vector<8x128xf32>
    %115 = arith.addf %109, %114 : vector<8x128xf32>
    %c19 = arith.constant 19 : index
    %c0_42 = arith.constant 0 : index
    %c0_43 = arith.constant 0 : index
    %116 = vector.load %arg7[%c19, %c0_42, %c0_43] : memref<32x8x128xf32, #tpu.memory_space<vmem>>, vector<1x8x128xf32>
    %117 = vector.shape_cast %116 : vector<1x8x128xf32> to vector<8x128xf32>
    %118 = vector.extract_strided_slice %2 {offsets = [0, 19], sizes = [8, 1], strides = [1, 1]} : vector<8x32xf32> to vector<8x1xf32>
    %119 = vector.broadcast %118 : vector<8x1xf32> to vector<8x128xf32>
    %120 = arith.mulf %117, %119 : vector<8x128xf32>
    %121 = arith.addf %115, %120 : vector<8x128xf32>
    %c20 = arith.constant 20 : index
    %c0_44 = arith.constant 0 : index
    %c0_45 = arith.constant 0 : index
    %122 = vector.load %arg7[%c20, %c0_44, %c0_45] : memref<32x8x128xf32, #tpu.memory_space<vmem>>, vector<1x8x128xf32>
    %123 = vector.shape_cast %122 : vector<1x8x128xf32> to vector<8x128xf32>
    %124 = vector.extract_strided_slice %2 {offsets = [0, 20], sizes = [8, 1], strides = [1, 1]} : vector<8x32xf32> to vector<8x1xf32>
    %125 = vector.broadcast %124 : vector<8x1xf32> to vector<8x128xf32>
    %126 = arith.mulf %123, %125 : vector<8x128xf32>
    %127 = arith.addf %121, %126 : vector<8x128xf32>
    %c21 = arith.constant 21 : index
    %c0_46 = arith.constant 0 : index
    %c0_47 = arith.constant 0 : index
    %128 = vector.load %arg7[%c21, %c0_46, %c0_47] : memref<32x8x128xf32, #tpu.memory_space<vmem>>, vector<1x8x128xf32>
    %129 = vector.shape_cast %128 : vector<1x8x128xf32> to vector<8x128xf32>
    %130 = vector.extract_strided_slice %2 {offsets = [0, 21], sizes = [8, 1], strides = [1, 1]} : vector<8x32xf32> to vector<8x1xf32>
    %131 = vector.broadcast %130 : vector<8x1xf32> to vector<8x128xf32>
    %132 = arith.mulf %129, %131 : vector<8x128xf32>
    %133 = arith.addf %127, %132 : vector<8x128xf32>
    %c22 = arith.constant 22 : index
    %c0_48 = arith.constant 0 : index
    %c0_49 = arith.constant 0 : index
    %134 = vector.load %arg7[%c22, %c0_48, %c0_49] : memref<32x8x128xf32, #tpu.memory_space<vmem>>, vector<1x8x128xf32>
    %135 = vector.shape_cast %134 : vector<1x8x128xf32> to vector<8x128xf32>
    %136 = vector.extract_strided_slice %2 {offsets = [0, 22], sizes = [8, 1], strides = [1, 1]} : vector<8x32xf32> to vector<8x1xf32>
    %137 = vector.broadcast %136 : vector<8x1xf32> to vector<8x128xf32>
    %138 = arith.mulf %135, %137 : vector<8x128xf32>
    %139 = arith.addf %133, %138 : vector<8x128xf32>
    %c23 = arith.constant 23 : index
    %c0_50 = arith.constant 0 : index
    %c0_51 = arith.constant 0 : index
    %140 = vector.load %arg7[%c23, %c0_50, %c0_51] : memref<32x8x128xf32, #tpu.memory_space<vmem>>, vector<1x8x128xf32>
    %141 = vector.shape_cast %140 : vector<1x8x128xf32> to vector<8x128xf32>
    %142 = vector.extract_strided_slice %2 {offsets = [0, 23], sizes = [8, 1], strides = [1, 1]} : vector<8x32xf32> to vector<8x1xf32>
    %143 = vector.broadcast %142 : vector<8x1xf32> to vector<8x128xf32>
    %144 = arith.mulf %141, %143 : vector<8x128xf32>
    %145 = arith.addf %139, %144 : vector<8x128xf32>
    %c24 = arith.constant 24 : index
    %c0_52 = arith.constant 0 : index
    %c0_53 = arith.constant 0 : index
    %146 = vector.load %arg7[%c24, %c0_52, %c0_53] : memref<32x8x128xf32, #tpu.memory_space<vmem>>, vector<1x8x128xf32>
    %147 = vector.shape_cast %146 : vector<1x8x128xf32> to vector<8x128xf32>
    %148 = vector.extract_strided_slice %2 {offsets = [0, 24], sizes = [8, 1], strides = [1, 1]} : vector<8x32xf32> to vector<8x1xf32>
    %149 = vector.broadcast %148 : vector<8x1xf32> to vector<8x128xf32>
    %150 = arith.mulf %147, %149 : vector<8x128xf32>
    %151 = arith.addf %145, %150 : vector<8x128xf32>
    %c25 = arith.constant 25 : index
    %c0_54 = arith.constant 0 : index
    %c0_55 = arith.constant 0 : index
    %152 = vector.load %arg7[%c25, %c0_54, %c0_55] : memref<32x8x128xf32, #tpu.memory_space<vmem>>, vector<1x8x128xf32>
    %153 = vector.shape_cast %152 : vector<1x8x128xf32> to vector<8x128xf32>
    %154 = vector.extract_strided_slice %2 {offsets = [0, 25], sizes = [8, 1], strides = [1, 1]} : vector<8x32xf32> to vector<8x1xf32>
    %155 = vector.broadcast %154 : vector<8x1xf32> to vector<8x128xf32>
    %156 = arith.mulf %153, %155 : vector<8x128xf32>
    %157 = arith.addf %151, %156 : vector<8x128xf32>
    %c26 = arith.constant 26 : index
    %c0_56 = arith.constant 0 : index
    %c0_57 = arith.constant 0 : index
    %158 = vector.load %arg7[%c26, %c0_56, %c0_57] : memref<32x8x128xf32, #tpu.memory_space<vmem>>, vector<1x8x128xf32>
    %159 = vector.shape_cast %158 : vector<1x8x128xf32> to vector<8x128xf32>
    %160 = vector.extract_strided_slice %2 {offsets = [0, 26], sizes = [8, 1], strides = [1, 1]} : vector<8x32xf32> to vector<8x1xf32>
    %161 = vector.broadcast %160 : vector<8x1xf32> to vector<8x128xf32>
    %162 = arith.mulf %159, %161 : vector<8x128xf32>
    %163 = arith.addf %157, %162 : vector<8x128xf32>
    %c27 = arith.constant 27 : index
    %c0_58 = arith.constant 0 : index
    %c0_59 = arith.constant 0 : index
    %164 = vector.load %arg7[%c27, %c0_58, %c0_59] : memref<32x8x128xf32, #tpu.memory_space<vmem>>, vector<1x8x128xf32>
    %165 = vector.shape_cast %164 : vector<1x8x128xf32> to vector<8x128xf32>
    %166 = vector.extract_strided_slice %2 {offsets = [0, 27], sizes = [8, 1], strides = [1, 1]} : vector<8x32xf32> to vector<8x1xf32>
    %167 = vector.broadcast %166 : vector<8x1xf32> to vector<8x128xf32>
    %168 = arith.mulf %165, %167 : vector<8x128xf32>
    %169 = arith.addf %163, %168 : vector<8x128xf32>
    %c28 = arith.constant 28 : index
    %c0_60 = arith.constant 0 : index
    %c0_61 = arith.constant 0 : index
    %170 = vector.load %arg7[%c28, %c0_60, %c0_61] : memref<32x8x128xf32, #tpu.memory_space<vmem>>, vector<1x8x128xf32>
    %171 = vector.shape_cast %170 : vector<1x8x128xf32> to vector<8x128xf32>
    %172 = vector.extract_strided_slice %2 {offsets = [0, 28], sizes = [8, 1], strides = [1, 1]} : vector<8x32xf32> to vector<8x1xf32>
    %173 = vector.broadcast %172 : vector<8x1xf32> to vector<8x128xf32>
    %174 = arith.mulf %171, %173 : vector<8x128xf32>
    %175 = arith.addf %169, %174 : vector<8x128xf32>
    %c29 = arith.constant 29 : index
    %c0_62 = arith.constant 0 : index
    %c0_63 = arith.constant 0 : index
    %176 = vector.load %arg7[%c29, %c0_62, %c0_63] : memref<32x8x128xf32, #tpu.memory_space<vmem>>, vector<1x8x128xf32>
    %177 = vector.shape_cast %176 : vector<1x8x128xf32> to vector<8x128xf32>
    %178 = vector.extract_strided_slice %2 {offsets = [0, 29], sizes = [8, 1], strides = [1, 1]} : vector<8x32xf32> to vector<8x1xf32>
    %179 = vector.broadcast %178 : vector<8x1xf32> to vector<8x128xf32>
    %180 = arith.mulf %177, %179 : vector<8x128xf32>
    %181 = arith.addf %175, %180 : vector<8x128xf32>
    %c30 = arith.constant 30 : index
    %c0_64 = arith.constant 0 : index
    %c0_65 = arith.constant 0 : index
    %182 = vector.load %arg7[%c30, %c0_64, %c0_65] : memref<32x8x128xf32, #tpu.memory_space<vmem>>, vector<1x8x128xf32>
    %183 = vector.shape_cast %182 : vector<1x8x128xf32> to vector<8x128xf32>
    %184 = vector.extract_strided_slice %2 {offsets = [0, 30], sizes = [8, 1], strides = [1, 1]} : vector<8x32xf32> to vector<8x1xf32>
    %185 = vector.broadcast %184 : vector<8x1xf32> to vector<8x128xf32>
    %186 = arith.mulf %183, %185 : vector<8x128xf32>
    %187 = arith.addf %181, %186 : vector<8x128xf32>
    %c31 = arith.constant 31 : index
    %c0_66 = arith.constant 0 : index
    %c0_67 = arith.constant 0 : index
    %188 = vector.load %arg7[%c31, %c0_66, %c0_67] : memref<32x8x128xf32, #tpu.memory_space<vmem>>, vector<1x8x128xf32>
    %189 = vector.shape_cast %188 : vector<1x8x128xf32> to vector<8x128xf32>
    %190 = vector.extract_strided_slice %2 {offsets = [0, 31], sizes = [8, 1], strides = [1, 1]} : vector<8x32xf32> to vector<8x1xf32>
    %191 = vector.broadcast %190 : vector<8x1xf32> to vector<8x128xf32>
    %192 = arith.mulf %189, %191 : vector<8x128xf32>
    %193 = arith.addf %187, %192 : vector<8x128xf32>
    %c0_68 = arith.constant 0 : index
    %c0_69 = arith.constant 0 : index
    %194 = vector.load %arg8[%c0_68, %c0_69] : memref<8x128xf32, #tpu.memory_space<vmem>>, vector<8x128xf32>
    %cst_70 = arith.constant dense<0.000000e+00> : vector<8xf32>
    %195 = vector.multi_reduction <add>, %194, %cst_70 [1] : vector<8x128xf32> to vector<8xf32>
    %196 = vector.shape_cast %195 : vector<8xf32> to vector<8x1xf32>
    %cst_71 = arith.constant dense<0.000000e+00> : vector<8xf32>
    %197 = vector.multi_reduction <add>, %193, %cst_71 [1] : vector<8x128xf32> to vector<8xf32>
    %198 = vector.shape_cast %197 : vector<8xf32> to vector<8x1xf32>
    %199 = arith.mulf %193, %194 : vector<8x128xf32>
    %cst_72 = arith.constant dense<0.000000e+00> : vector<8xf32>
    %200 = vector.multi_reduction <add>, %199, %cst_72 [1] : vector<8x128xf32> to vector<8xf32>
    %201 = vector.shape_cast %200 : vector<8xf32> to vector<8x1xf32>
    %202 = arith.mulf %193, %193 : vector<8x128xf32>
    %cst_73 = arith.constant dense<0.000000e+00> : vector<8xf32>
    %203 = vector.multi_reduction <add>, %202, %cst_73 [1] : vector<8x128xf32> to vector<8xf32>
    %204 = vector.shape_cast %203 : vector<8xf32> to vector<8x1xf32>
    %205 = arith.mulf %202, %194 : vector<8x128xf32>
    %cst_74 = arith.constant dense<0.000000e+00> : vector<8xf32>
    %206 = vector.multi_reduction <add>, %205, %cst_74 [1] : vector<8x128xf32> to vector<8xf32>
    %207 = vector.shape_cast %206 : vector<8xf32> to vector<8x1xf32>
    %cst_75 = arith.constant 1.280000e+02 : f32
    %208 = vector.broadcast %cst_75 : f32 to vector<8x1xf32>
    %209 = arith.subf %208, %196 : vector<8x1xf32>
    %210 = arith.subf %198, %201 : vector<8x1xf32>
    %cst_76 = arith.constant 0.000000e+00 : f32
    %211 = vector.broadcast %cst_76 : f32 to vector<8x1xf32>
    %212 = arith.cmpf oeq, %196, %211 : vector<8x1xf32>
    %cst_77 = arith.constant 1.000000e+00 : f32
    %213 = vector.broadcast %cst_77 : f32 to vector<8x1xf32>
    %214 = arith.select %212, %213, %196 : vector<8x1xi1>, vector<8x1xf32>
    %cst_78 = arith.constant 0.000000e+00 : f32
    %215 = vector.broadcast %cst_78 : f32 to vector<8x1xf32>
    %216 = arith.cmpf oeq, %209, %215 : vector<8x1xf32>
    %cst_79 = arith.constant 1.000000e+00 : f32
    %217 = vector.broadcast %cst_79 : f32 to vector<8x1xf32>
    %218 = arith.select %216, %217, %209 : vector<8x1xi1>, vector<8x1xf32>
    %c0_80 = arith.constant 0 : index
    %c0_81 = arith.constant 0 : index
    %219 = vector.load %arg3[%c0_80, %c0_81] : memref<8x1xf32, #tpu.memory_space<vmem>>, vector<8x1xf32>
    %c0_82 = arith.constant 0 : index
    %c0_83 = arith.constant 0 : index
    %220 = vector.load %arg4[%c0_82, %c0_83] : memref<8x1xf32, #tpu.memory_space<vmem>>, vector<8x1xf32>
    %c0_84 = arith.constant 0 : index
    %c0_85 = arith.constant 0 : index
    %221 = vector.load %arg5[%c0_84, %c0_85] : memref<8x1xf32, #tpu.memory_space<vmem>>, vector<8x1xf32>
    %c0_86 = arith.constant 0 : index
    %c0_87 = arith.constant 0 : index
    %222 = vector.load %arg6[%c0_86, %c0_87] : memref<8x1xf32, #tpu.memory_space<vmem>>, vector<8x1xf32>
    %cst_88 = arith.constant 2.000000e+00 : f32
    %223 = vector.broadcast %cst_88 : f32 to vector<8x1xf32>
    %224 = arith.mulf %223, %219 : vector<8x1xf32>
    %225 = arith.mulf %224, %201 : vector<8x1xf32>
    %226 = arith.subf %207, %225 : vector<8x1xf32>
    %227 = arith.mulf %219, %219 : vector<8x1xf32>
    %228 = arith.mulf %227, %196 : vector<8x1xf32>
    %229 = arith.addf %226, %228 : vector<8x1xf32>
    %230 = arith.subf %204, %207 : vector<8x1xf32>
    %cst_89 = arith.constant 2.000000e+00 : f32
    %231 = vector.broadcast %cst_89 : f32 to vector<8x1xf32>
    %232 = arith.mulf %231, %220 : vector<8x1xf32>
    %233 = arith.mulf %232, %210 : vector<8x1xf32>
    %234 = arith.subf %230, %233 : vector<8x1xf32>
    %235 = arith.mulf %220, %220 : vector<8x1xf32>
    %236 = arith.mulf %235, %209 : vector<8x1xf32>
    %237 = arith.addf %234, %236 : vector<8x1xf32>
    %cst_90 = arith.constant 1.000000e+00 : f32
    %238 = vector.broadcast %cst_90 : f32 to vector<8x1xf32>
    %239 = arith.subf %238, %222 : vector<8x1xf32>
    %240 = arith.divf %239, %214 : vector<8x1xf32>
    %241 = arith.mulf %240, %229 : vector<8x1xf32>
    %242 = arith.divf %222, %218 : vector<8x1xf32>
    %243 = arith.mulf %242, %237 : vector<8x1xf32>
    %244 = arith.addf %241, %243 : vector<8x1xf32>
    %cst_91 = arith.constant 1.000000e+00 : f32
    %245 = vector.broadcast %cst_91 : f32 to vector<8x1xf32>
    %246 = arith.addf %245, %221 : vector<8x1xf32>
    %cst_92 = arith.constant 2.000000e+00 : f32
    %247 = vector.broadcast %cst_92 : f32 to vector<8x1xf32>
    %248 = arith.mulf %247, %246 : vector<8x1xf32>
    %249 = arith.mulf %248, %222 : vector<8x1xf32>
    %250 = arith.divf %249, %218 : vector<8x1xf32>
    %251 = arith.mulf %250, %210 : vector<8x1xf32>
    %252 = arith.addf %244, %251 : vector<8x1xf32>
    %cst_93 = arith.constant 1.000000e+00 : f32
    %253 = vector.broadcast %cst_93 : f32 to vector<8x1xf32>
    %254 = arith.addf %253, %221 : vector<8x1xf32>
    %cst_94 = arith.constant 2.000000e+00 : f32
    %255 = vector.broadcast %cst_94 : f32 to vector<8x1xf32>
    %256 = arith.mulf %255, %254 : vector<8x1xf32>
    %cst_95 = arith.constant 1.000000e+00 : f32
    %257 = vector.broadcast %cst_95 : f32 to vector<8x1xf32>
    %258 = arith.subf %257, %222 : vector<8x1xf32>
    %259 = arith.mulf %256, %258 : vector<8x1xf32>
    %260 = arith.divf %259, %214 : vector<8x1xf32>
    %261 = arith.mulf %260, %201 : vector<8x1xf32>
    %262 = arith.subf %252, %261 : vector<8x1xf32>
    %c0_96 = arith.constant 0 : index
    %c0_97 = arith.constant 0 : index
    %263 = vector.load %arg9[%c0_96, %c0_97] : memref<8x1xf32, #tpu.memory_space<vmem>>, vector<8x1xf32>
    tpu.vector_store %arg9[%c0_96, %c0_97], %262 {strides = array<i32>} : memref<8x1xf32, #tpu.memory_space<vmem>>, vector<8x1xf32>,
    return
  }
  func.func @transform_0(%arg0: i32) -> (i32, i32) {
    %c0_i32 = arith.constant 0 : i32
    %c0_i32_0 = arith.constant 0 : i32
    %c0_i32_1 = arith.constant 0 : i32
    return %c0_i32, %c0_i32_0 : i32, i32
  }
  func.func @transform_1(%arg0: i32) -> (i32, i32) {
    %c0_i32 = arith.constant 0 : i32
    %c0_i32_0 = arith.constant 0 : i32
    return %arg0, %c0_i32 : i32, i32
  }
  func.func @transform_2(%arg0: i32) -> (i32, i32) {
    %c0_i32 = arith.constant 0 : i32
    %c0_i32_0 = arith.constant 0 : i32
    return %arg0, %c0_i32 : i32, i32
  }
  func.func @transform_3(%arg0: i32) -> (i32, i32) {
    %c0_i32 = arith.constant 0 : i32
    %c0_i32_0 = arith.constant 0 : i32
    return %arg0, %c0_i32 : i32, i32
  }
  func.func @transform_4(%arg0: i32) -> (i32, i32) {
    %c0_i32 = arith.constant 0 : i32
    %c0_i32_0 = arith.constant 0 : i32
    return %arg0, %c0_i32 : i32, i32
  }
  func.func @transform_5(%arg0: i32) -> (i32, i32) {
    %c0_i32 = arith.constant 0 : i32
    %c0_i32_0 = arith.constant 0 : i32
    return %arg0, %c0_i32 : i32, i32
  }
  func.func @transform_6(%arg0: i32) -> (i32, i32, i32) {
    %c0_i32 = arith.constant 0 : i32
    %c0_i32_0 = arith.constant 0 : i32
    %c0_i32_1 = arith.constant 0 : i32
    return %c0_i32, %arg0, %c0_i32_0 : i32, i32, i32
  }
  func.func @transform_7(%arg0: i32) -> (i32, i32) {
    %c0_i32 = arith.constant 0 : i32
    %c0_i32_0 = arith.constant 0 : i32
    return %arg0, %c0_i32 : i32, i32
  }
  func.func @transform_8(%arg0: i32) -> (i32, i32) {
    %c0_i32 = arith.constant 0 : i32
    %c0_i32_0 = arith.constant 0 : i32
    return %arg0, %c0_i32 : i32, i32
  }
}

</mosaic_0001>

<bundles_post_ra>
// kernel: tpu_custom_call.1
= control target key start
LH: loop header
LB: loop body
LE: loop exit
PB: predicated region body
PF: predicated region fallthrough
CT: control target
= control target key end

     0   :  { %13 = vsyncpa [#allocation3], 0  ;;  %s2060_s0 = inlined_call_operand.vmem [shape: f32[32,8], index: 0, kind: input, shape index: {}]   ;;  %s2061_s1 = inlined_call_operand.vmem [shape: f32[16,8], index: 1, kind: input, shape index: {}]   ;;  %s2062_s2 = inlined_call_operand.vmem [shape: f32[16,1], index: 2, kind: input, shape index: {}]   ;;  %s2063_s3 = inlined_call_operand.vmem [shape: f32[16,1], index: 3, kind: input, shape index: {}]   ;;  %s2064_s4 = inlined_call_operand.vmem [shape: f32[16,1], index: 4, kind: input, shape index: {}]   ;;  %s2065_s5 = inlined_call_operand.vmem [shape: f32[16,1], index: 5, kind: input, shape index: {}]   ;;  %s2066_s6 = inlined_call_operand.hbm [shape: f32[32,16,128], index: 6, kind: input, shape index: {}]   ;;  %s2067_s7 = inlined_call_operand.vmem [shape: f32[16,128], index: 7, kind: input, shape index: {}]   ;;  %s2068_s8 = inlined_call_operand.vmem [shape: f32[16,1], index: 8, kind: output, shape index: {}]  }
   0x1   :  { %15 = vsyncpa [#allocation3 + $0x1], 0  ;;  %s1783_s27 = smov 0   ;;  %s1785_s28 = smov 0  }
   0x2   :  { %s1787_s29 = smov 0   ;;  %s1789_s30 = smov 0  }
   0x3 LB: > { %s1802_s9 = sadd.s32 4294967295, %s1698_s30   ;;  %s1805_s10 = sadd.s32 1, %s1698_s30   ;;  %s1698_s30 = sphi %s1789_s30, %s2076_s30   ;;  %s1694_s29 = sphi %s1787_s29, %s2075_s29   ;;  %s1690_s28 = sphi %s1785_s28, %s2074_s28   ;;  %s1686_s27 = sphi %s1783_s27, %s2073_s27  }
   0x4   : > { %s176_s11 = ssub.s32 %s1698_s30, %s1805_s10  ;;  %s179_s12 = sadd.s32 1, %s1694_s29 }
   0x5   : > { %p177_p0 = scmp.eq.s32.totalorder %s176_s11, 0  ;;  %p186_p1 = scmp.ne.s32.totalorder %s1694_s29, %s1690_s28 }
   0x6   : > { %p187_p2 = scmp.eq.s32.totalorder %s1698_s30, 0  ;;  %p192_p3 = scmp.ne.s32.totalorder %s1690_s28, %s1686_s27 }
   0x7   : > { %s1815_s13 = scalar_select %p177_p0, %s1694_s29, %s179_s12  }
   0x8   : > { %p188_p4 = por %p187_p2, %p186_p1  ;;  %p193_p5 = scmp.eq.s32.totalorder %s1802_s9, 0 }
   0x9   : > { %p1529_p6 = scmp.lt.s32.totalorder %s1698_s30, 2  ;;  %s306_s15 = sand.u32 1, %s1694_s29  }
   0xa   : > { %p1819_p7 = por %p193_p5, %p192_p3  ;;  %s1383_s16 = sshll.u32 %s306_s15, 8 }
   0xb   : > { %s1384_s17 = sshll.u32 %s1698_s30, 7  ;;  %s310_s21 = scalar_lea.vmem [#allocation2], %s1383_s16 }
   0xc   : > { %s2070_s14 = scalar_select %p1819_p7, 1, 0 }
   0xd   : > { %s1828_s20 = scalar_lea.hbm %s2066_s6, %s1384_s17  ;;  %s316_s22 = sshll.u32 %s310_s21, 4  ;;  %s1830_s22 = int_to_ptr.vmem [resolvable:$true] %s316_s22 }
   0xe   : > { %p1832_p8 = pnand %p1529_p6, %p188_p4  ;;  %s1836_s24 = scalar_lea.sflag [#allocation3], %s306_s15 }
   0xf   : > { %s1636_s25 = scalar_lea.hbm %s1828_s20, 4096  ;;  %s1641_s11 = scalar_lea.hbm %s2066_s6, 8192 }
  0x10   : > { %p1637_p9 = scmp.ne.s32.totalorder %s1828_s20, %s1636_s25  ;;  %p1638_p10 = pneg %p1832_p8 }
  0x11   : > { %p1642_p13 = scmp.lt.s32.totalorder %s1828_s20, %s2066_s6  ;;  %p1643_p0 = scmp.lt.s32.totalorder %s1641_s11, %s1636_s25 }
  0x12   : > { %p1639_p11 = pnand %p1638_p10, %p1637_p9 }
  0x13   : > { %p1644_p1 = por %p1643_p0, %p1642_p13 }
  0x14   : > { %p1640_p12 = pneg %p1639_p11 }
  0x16   : > { %p1645_p2 = pnand %p1644_p1, %p1640_p12 }
  0x18   : > { %1648 = shalt.err (!%p1645_p2)
}
  0x19   : > { %s1649_s15 = scalar_lea.vmem %s1830_s22, 4096  ;;  %s1700_s17 = smov [#allocation2]  }
  0x1a   : > { %p1650_p3 = scmp.ne.s32.totalorder %s1830_s22, %s1649_s15  ;;  %s1654_s18 = sshll.u32 %s1700_s17, 4  ;;  %s1655_s18 = int_to_ptr.vmem [resolvable:$false] %s1654_s18 }
  0x1b   : > { %s1656_s19 = scalar_lea.vmem %s1655_s18, 8192  ;;  %p1657_p6 = scmp.lt.s32.totalorder %s1830_s22, %s1655_s18 }
  0x1c   : > { %p1652_p4 = pnand %p1650_p3, %p1638_p10  ;;  %p1658_p9 = scmp.lt.s32.totalorder %s1656_s19, %s1649_s15 }
  0x1e   : > { %p1653_p5 = pneg %p1652_p4  ;;  %p1659_p11 = por %p1658_p9, %p1657_p6 }
  0x20   : > { %p1660_p7 = pnand %p1659_p11, %p1653_p5 }
  0x22   : > { %1663 = shalt.err (!%p1660_p7)
}
  0x23   : > { %s1701_s21 = smov 256   ;;  %s1702_s25 = smov 128  }
  0x24   : > { %s1703_s26 = smov 8   ;;  %p1385_p10 = scmp.ge.s32.totalorder %s1698_s30, 1 }
  0x25   : > { %1528 = dma.hbm_to_vmem [thread:$0]  (!%p1832_p8), %s1828_s20, 4096, %s1830_s22, %s1836_s24, %s1701_s21, %s1702_s25, %s1703_s26  }
  0x26   : > { %p331_p12 = scmp.lt.s32.totalorder %s1698_s30, 3 }
  0x28   : > { %p332_p13 = pnand %p1385_p10, %p331_p12 }
  0x29   : > { %s337_s27 = sand.u32 (!%p332_p13), 1, %s1690_s28   ;;  %p2072_p7 = scmp.ne.s32.totalorder (!%p332_p13), %s2070_s14, 0 }
  0x2a   : > { %335 = sbr.rel (%p332_p13) target bundleno = 689 (0x2b1), region = 52  ;;  %s1386_s11 = sshll.u32 (!%p332_p13), %s337_s27, 8 }
  0x2b   : > { %s338_s12 = scalar_lea.sflag (!%p332_p13), [#allocation3], %s337_s27  ;;  %s1860_s16 = scalar_lea.vmem (!%p332_p13), [#allocation2], %s1386_s11 }
  0x2f   : > { %1681 = dma.done.wait (%p2072_p7), %s338_s12, 4096  }
  0x30   : > { %1683 = vsyncadd (%p2072_p7), %s338_s12, 4294963200  ;;  %p397_p0 = scmp.lt.s32.totalorder %s1802_s9, 1  ;;  %v1704_v0 = vmov 0.0   ;;  %vm1705_vm0 = vmmov 0   ;;  %vm430_vm1 = vcmask 64512   ;;  %v429_v1 = vld [vmem:[%s2060_s0 + $0x18] sm:$0xff] }
  0x31   : > { %1457 = vmatprep.subr.mxu0 %v1704_v0  ;;  %1468 = vmatprep.subr.mxu1 %v1704_v0  ;;  %v428_v2 = vld [vmem:[%s2060_s0 + $0x10] sm:$0xff]  ;;  %v427_v3 = vld [vmem:[%s2060_s0 + $0x8] sm:$0xff]  ;;  %v444_v4 = vsel %vm430_vm1, %v429_v1, 0  ;;  %v426_v7 = vld [vmem:[%s2060_s0] sm:$0xff]  ;;  %v1706_v36 = vmov 2   ;;  %v1707_v37 = vmov 0  }
  0x32   : > { %1465 = vmatprep.mubr.msk.f32.mxu0 %vm1705_vm0, %v1704_v0  ;;  %s2078_s9 = smov (!%p397_p0, %s1802_s9), 1  ;;  %1476 = vmatprep.mubr.msk.f32.mxu1 %vm1705_vm0, %v1704_v0  ;;  %v441_v5 = vsel %vm430_vm1, %v428_v2, 0  ;;  %v438_v6 = vsel %vm430_vm1, %v427_v3, 0  ;;  %v1892_v9 = vand.u32 4294901760, %v444_v4  ;;  %v435_v12 = vsel %vm430_vm1, %v426_v7, 0 }
  0x33   : > { %s1874_s30 = sshll.u32 %s2078_s9, 3  ;;  %v1894_v10 = vand.u32 4294901760, %v441_v5  ;;  %v1896_v11 = vand.u32 4294901760, %v438_v6  ;;  %v1898_v13 = vand.u32 4294901760, %v435_v12  ;;  %1601 = vset.pattern.permute.xlu1 %v1706_v36  ;;  %1599 = vset.pattern.permute.xlu0 %v1707_v37  ;;  %v1708_v55 = vmov 3  }
  0x34   : > { %s400_s22 = scalar_lea.vmem %s2061_s1, %s1874_s30  ;;  %1458 = vmatpush3.xpose.msra.mxu0 %v1892_v9  ;;  %v551_v15 = vsub.f32 %v444_v4, %v1892_v9  ;;  %v1709_v56 = vmov 1   ;;  %v1710_v57 = vmov 4   ;;  %v1711_v58 = vmov 5   ;;  %s420_s27 = scalar_lea.vmem %s2067_s7, %s1874_s30 }
  0x35   : > { %v425_v8 = vld [vmem:[%s400_s22] sm:$0xff]  ;;  %v558_v16 = vsub.f32 %v441_v5, %v1894_v10  ;;  %v565_v18 = vsub.f32 %v438_v6, %v1896_v11  ;;  %1459 = vmatprep.subr.mxu0 %v1704_v0  ;;  %v572_v22 = vsub.f32 %v435_v12, %v1898_v13  ;;  %v1712_v59 = vmov 6   ;;  %s404_s22 = scalar_lea.vmem %s2062_s2, %s1874_s30  ;;  %s416_s15 = scalar_lea.vmem %s2065_s5, %s1874_s30 }
  0x36   : > { %v432_v14 = vsel %vm430_vm1, %v425_v8, 0  ;;  %v552_v19 = vand.u32 4294901760, %v551_v15  ;;  %v1713_v60 = vmov 8   ;;  %v1714_v61 = vmov 7   ;;  %s408_s19 = scalar_lea.vmem %s2063_s3, %s1874_s30  ;;  %s424_s25 = scalar_lea.vmem %s2068_s8, %s1874_s30 }
  0x37   : > { %v1903_v17 = vand.u32 4294901760, %v432_v14  ;;  %v559_v20 = vand.u32 4294901760, %v558_v16  ;;  %v566_v26 = vand.u32 4294901760, %v565_v18  ;;  %v573_v31 = vand.u32 4294901760, %v572_v22 }
  0x38   : > { %1460 = vmatpush3.xpose.msra.mxu0 %v1894_v10  ;;  %v553_v23 = vsub.f32 %v551_v15, %v552_v19  ;;  %v1715_v62 = vmov 11   ;;  %v1716_v63 = vmov 9   ;;  %v1718_v1 = vmov 10  }
  0x39   : > { %v516_v21 = vsub.f32 %v432_v14, %v1903_v17  ;;  %v560_v24 = vsub.f32 %v558_v16, %v559_v20  ;;  %1461 = vmatprep.subr.mxu0 %v1704_v0  ;;  %v567_v30 = vsub.f32 %v565_v18, %v566_v26  ;;  %v574_v34 = vsub.f32 %v572_v22, %v573_v31 }
  0x3a   : > { %v554_v27 = vand.u32 4294901760, %v553_v23  ;;  %v1719_v2 = vmov 17   ;;  %v1720_v3 = vmov 12   ;;  %v1721_v4 = vmov 20  }
  0x3b   : > { %v517_v25 = vand.u32 4294901760, %v516_v21  ;;  %v561_v29 = vand.u32 4294901760, %v560_v24  ;;  %v568_v33 = vand.u32 4294901760, %v567_v30  ;;  %v575_v35 = vand.u32 4294901760, %v574_v34  ;;  %v931_v24 = vld [vmem:[%s1860_s16] sm:$0xff] }
  0x3c   : > { %1462 = vmatpush3.xpose.msra.mxu0 %v1896_v11  ;;  %1469 = vmatpush3.xpose.msra.mxu1 %v554_v27  ;;  %v1722_v5 = vmov 13   ;;  %v1723_v6 = vmov 23   ;;  %v1724_v7 = vmov 15   ;;  %v1725_v8 = vmov 26   ;;  %v1397_v34 = vld [vmem:[%s1860_s16 + $0x20] sm:$0xff] }
  0x3d   : > { %v518_v28 = vsub.f32 %v516_v21, %v517_v25  ;;  %1463 = vmatprep.subr.mxu0 %v1704_v0  ;;  %1470 = vmatprep.subr.mxu1 %v1704_v0  ;;  %v1729_v12 = vmov 31   ;;  %v1731_v14 = vmov 21   ;;  %vm1241_vm4 = vcmask 7168  }
  0x3f   : > { %v519_v32 = vand.u32 4294901760, %v518_v28 }
  0x40   : > { %1464 = vmatpush3.xpose.msra.mxu0 %v1898_v13  ;;  %1471 = vmatpush3.xpose.msra.mxu1 %v561_v29 }
  0x41   : > { %1472 = vmatprep.subr.mxu1 %v1704_v0  ;;  %1479 = vmatprep.subr.mxu0 %v1704_v0 }
  0x43   : > { %1466 = vmatmul.mubr.f32.vlgmr.msra.gmra.mxu0 %v519_v32 }
  0x44   : > { %1473 = vmatpush3.xpose.msra.mxu1 %v568_v33  ;;  %1480 = vmatpush3.xpose.msra.mxu0 %v551_v15  ;;  %v1732_v15 = vmov 22  }
  0x45   : > { %1474 = vmatprep.subr.mxu1 %v1704_v0  ;;  %1481 = vmatprep.subr.mxu0 %v1704_v0 }
  0x46   : > { %1487 = vmatprep.mubr.msk.f32.mxu0 %vm1705_vm0, %v1704_v0 }
  0x48   : > { %1475 = vmatpush3.xpose.msra.mxu1 %v575_v35  ;;  %1482 = vmatpush3.xpose.msra.mxu0 %v558_v16  ;;  %v1733_v16 = vmov 24  }
  0x49   : > { %1483 = vmatprep.subr.mxu0 %v1704_v0  ;;  %1490 = vmatprep.subr.mxu1 %v1704_v0 }
  0x4b   : > { %1477 = vmatmul.mubr.f32.vlgmr.msra.gmra.mxu1 %v1903_v17 }
  0x4c   : > { %1484 = vmatpush3.xpose.msra.mxu0 %v565_v18  ;;  %1491 = vmatpush3.xpose.msra.mxu1 %v1892_v9  ;;  %v1986_v18 = vld [vmem:[%s420_s27] sm:$0xff] }
  0x4d   : > { %1485 = vmatprep.subr.mxu0 %v1704_v0  ;;  %1492 = vmatprep.subr.mxu1 %v1704_v0 }
  0x4e   : > { %1498 = vmatprep.mubr.msk.f32.mxu1 %vm1705_vm0, %v1704_v0 }
  0x50   : > { %1486 = vmatpush3.xpose.msra.mxu0 %v572_v22  ;;  %1493 = vmatpush3.xpose.msra.mxu1 %v1894_v10 }
  0x51   : > { %1494 = vmatprep.subr.mxu1 %v1704_v0  ;;  %1501 = vmatprep.subr.mxu0 %v1704_v0 }
  0x53   : > { %1488 = vmatmul.mubr.f32.vlgmr.msra.gmra.mxu0 %v516_v21  ;;  %v1737_v21 = vmov 30  }
  0x54   : > { %1495 = vmatpush3.xpose.msra.mxu1 %v1896_v11  ;;  %1502 = vmatpush3.xpose.msra.mxu0 %v552_v19  ;;  %v1735_v19 = vmov 27  }
  0x55   : > { %1496 = vmatprep.subr.mxu1 %v1704_v0  ;;  %1503 = vmatprep.subr.mxu0 %v1704_v0 }
  0x56   : > { %1509 = vmatprep.mubr.msk.f32.mxu0 %vm1705_vm0, %v1704_v0 }
  0x58   : > { %1497 = vmatpush3.xpose.msra.mxu1 %v1898_v13  ;;  %1504 = vmatpush3.xpose.msra.mxu0 %v559_v20  ;;  %v1736_v20 = vmov 28  }
  0x59   : > { %1505 = vmatprep.subr.mxu0 %v1704_v0  ;;  %1512 = vmatprep.subr.mxu1 %v1704_v0 }
  0x5b   : > { %1499 = vmatmul.mubr.f32.vlgmr.msra.gmra.mxu1 %v517_v25  ;;  %v1394_v25 = vld [vmem:[%s1860_s16 + $0x8] sm:$0xff] }
  0x5c   : > { %1506 = vmatpush3.xpose.msra.mxu0 %v566_v26  ;;  %1513 = vmatpush3.xpose.msra.mxu1 %v1892_v9  ;;  %v1726_v9 = vmov 16   ;;  %v1395_v26 = vld [vmem:[%s1860_s16 + $0x10] sm:$0xff] }
  0x5d   : > { %1507 = vmatprep.subr.mxu0 %v1704_v0  ;;  %1514 = vmatprep.subr.mxu1 %v1704_v0 }
  0x5e   : > { %1520 = vmatprep.mubr.msk.f32.mxu1 %vm1705_vm0, %v1704_v0 }
  0x60   : > { %1508 = vmatpush3.xpose.msra.mxu0 %v573_v31  ;;  %1515 = vmatpush3.xpose.msra.mxu1 %v1894_v10  ;;  %v1727_v10 = vmov 29   ;;  %v1396_v31 = vld [vmem:[%s1860_s16 + $0x18] sm:$0xff] }
  0x61   : > { %1516 = vmatprep.subr.mxu1 %v1704_v0 }
  0x63   : > { %1510 = vmatmul.mubr.f32.vlgmr.msra.gmra.mxu0 %v1903_v17 }
  0x64   : > { %1517 = vmatpush3.xpose.msra.mxu1 %v1896_v11  ;;  %v1728_v11 = vmov 18  }
  0x65   : > { %1518 = vmatprep.subr.mxu1 %v1704_v0  ;;  %v1717_v0 = vmov 14  }
  0x68   : > { %1519 = vmatpush3.xpose.msra.mxu1 %v1898_v13  ;;  %v1730_v13 = vmov 19  }
  0x6b   : > { %1521 = vmatmul.mubr.f32.vlgmr.msra.gmra.mxu1 %v1903_v17  ;;  %v1734_v17 = vmov 25  }
 0x103   : > { %v521_v38 = vpop.f32.mrf.mxu0 }
 0x105   : > { %v1467_v39 = vpop.f32.mrf.mxu0 }
 0x10b   : > { %v612_v40 = vpop.f32.mrf.mxu1 }
 0x10c   : > { %v613_v47 = vadd.f32 %v612_v40, %v521_v38  ;;  %v1398_v40 = vld [vmem:[%s1860_s16 + $0x28] sm:$0xff] }
 0x10d   : > { %v1478_v41 = vpop.f32.mrf.mxu1 }
 0x113   : > { %v692_v42 = vpop.f32.mrf.mxu0 }
 0x114   : > { %v693_v49 = vadd.f32 %v692_v42, %v613_v47 }
 0x115   : > { %v1489_v43 = vpop.f32.mrf.mxu0 }
 0x116   : > { %v1399_v43 = vld [vmem:[%s1860_s16 + $0x30] sm:$0xff] }
 0x11b   : > { %v769_v44 = vpop.f32.mrf.mxu1 }
 0x11c   : > { %v770_v50 = vadd.f32 %v769_v44, %v693_v49 }
 0x11d   : > { %v1500_v45 = vpop.f32.mrf.mxu1 }
 0x123   : > { %v852_v46 = vpop.f32.mrf.mxu0 }
 0x124   : > { %v853_v51 = vadd.f32 %v852_v46, %v770_v50 }
 0x125   : > { %v1511_v48 = vpop.f32.mrf.mxu0 }
 0x126   : > { %v1400_v48 = vld [vmem:[%s1860_s16 + $0x38] sm:$0xff] }
 0x12b   : > { %v927_v52 = vpop.f32.mrf.mxu1 }
 0x12c   : > { %v1952_v53 = vadd.f32 %v927_v52, %v853_v51  ;;  %v1401_v52 = vld [vmem:[%s1860_s16 + $0x40] sm:$0xff] }
 0x12d   : > { %v1522_v54 = vpop.f32.mrf.mxu1 }
 0x12e   : > { %949 = vperm.xlu1 %1601, %v1952_v53   ;;  %934 = vperm.xlu0 %1599, %v1952_v53  }
 0x132   : > { %1602 = vset.pattern.permute.xlu1 %v1708_v55  ;;  %1600 = vset.pattern.permute.xlu0 %v1709_v56  ;;  %v1402_v55 = vld [vmem:[%s1860_s16 + $0x48] sm:$0xff] }
 0x133   : > { %957 = vperm.xlu1 %1602, %v1952_v53   ;;  %941 = vperm.xlu0 %1600, %v1952_v53  }
 0x137   : > { %1603 = vset.pattern.permute.xlu1 %v1710_v57  ;;  %1604 = vset.pattern.permute.xlu0 %v1711_v58 }
 0x138   : > { %965 = vperm.xlu1 %1603, %v1952_v53   ;;  %973 = vperm.xlu0 %1604, %v1952_v53  }
 0x13c   : > { %1605 = vset.pattern.permute.xlu1 %v1712_v59  ;;  %1607 = vset.pattern.permute.xlu0 %v1713_v60  ;;  %v1403_v60 = vld [vmem:[%s1860_s16 + $0x50] sm:$0xff] }
 0x13d   : > { %981 = vperm.xlu1 %1605, %v1952_v53   ;;  %997 = vperm.xlu0 %1607, %v1952_v53  }
 0x141   : > { %1606 = vset.pattern.permute.xlu1 %v1714_v61  ;;  %1610 = vset.pattern.permute.xlu0 %v1715_v62 }
 0x142   : > { %989 = vperm.xlu1 %1606, %v1952_v53   ;;  %1021 = vperm.xlu0 %1610, %v1952_v53  }
 0x146   : > { %1608 = vset.pattern.permute.xlu1 %v1716_v63  ;;  %1613 = vset.pattern.permute.xlu0 %v1717_v0  ;;  %v1404_v0 = vld [vmem:[%s1860_s16 + $0x58] sm:$0xff] }
 0x147   : > { %1005 = vperm.xlu1 %1608, %v1952_v53   ;;  %1045 = vperm.xlu0 %1613, %v1952_v53  }
 0x14b   : > { %1609 = vset.pattern.permute.xlu1 %v1718_v1  ;;  %1616 = vset.pattern.permute.xlu0 %v1719_v2 }
 0x14c   : > { %1013 = vperm.xlu1 %1609, %v1952_v53   ;;  %1069 = vperm.xlu0 %1616, %v1952_v53  }
 0x150   : > { %1611 = vset.pattern.permute.xlu1 %v1720_v3  ;;  %1619 = vset.pattern.permute.xlu0 %v1721_v4  ;;  %v1405_v3 = vld [vmem:[%s1860_s16 + $0x60] sm:$0xff] }
 0x151   : > { %1029 = vperm.xlu1 %1611, %v1952_v53   ;;  %1093 = vperm.xlu0 %1619, %v1952_v53  }
 0x155   : > { %1612 = vset.pattern.permute.xlu1 %v1722_v5  ;;  %1622 = vset.pattern.permute.xlu0 %v1723_v6 }
 0x156   : > { %1037 = vperm.xlu1 %1612, %v1952_v53   ;;  %1117 = vperm.xlu0 %1622, %v1952_v53  }
 0x15a   : > { %1614 = vset.pattern.permute.xlu1 %v1724_v7  ;;  %1625 = vset.pattern.permute.xlu0 %v1725_v8  ;;  %v1406_v8 = vld [vmem:[%s1860_s16 + $0x68] sm:$0xff] }
 0x15b   : > { %1053 = vperm.xlu1 %1614, %v1952_v53   ;;  %1141 = vperm.xlu0 %1625, %v1952_v53  }
 0x15f   : > { %1615 = vset.pattern.permute.xlu1 %v1726_v9  ;;  %1628 = vset.pattern.permute.xlu0 %v1727_v10 }
 0x160   : > { %1061 = vperm.xlu1 %1615, %v1952_v53   ;;  %1165 = vperm.xlu0 %1628, %v1952_v53  }
 0x164   : > { %1617 = vset.pattern.permute.xlu1 %v1728_v11  ;;  %1631 = vset.pattern.permute.xlu0 %v1729_v12 }
 0x165   : > { %1077 = vperm.xlu1 %1617, %v1952_v53  }
 0x169   : > { %1618 = vset.pattern.permute.xlu1 %v1730_v13 }
 0x16a   : > { %1085 = vperm.xlu1 %1618, %v1952_v53  }
 0x16e   : > { %1620 = vset.pattern.permute.xlu1 %v1731_v14 }
 0x16f   : > { %1101 = vperm.xlu1 %1620, %v1952_v53  }
 0x173   : > { %1621 = vset.pattern.permute.xlu1 %v1732_v15  ;;  %v1408_v15 = vld [vmem:[%s1860_s16 + $0x78] sm:$0xff] }
 0x174   : > { %1109 = vperm.xlu1 %1621, %v1952_v53  }
 0x178   : > { %1623 = vset.pattern.permute.xlu1 %v1733_v16 }
 0x179   : > { %1125 = vperm.xlu1 %1623, %v1952_v53  }
 0x17d   : > { %1624 = vset.pattern.permute.xlu1 %v1734_v17 }
 0x17e   : > { %1133 = vperm.xlu1 %1624, %v1952_v53  }
 0x17f   : > { %1187 = vadd.xlane.f32.xlu0 %v1986_v18 }
 0x182   : > { %1626 = vset.pattern.permute.xlu1 %v1735_v19 }
 0x183   : > { %1149 = vperm.xlu1 %1626, %v1952_v53  }
 0x187   : > { %1627 = vset.pattern.permute.xlu1 %v1736_v20 }
 0x188   : > { %1157 = vperm.xlu1 %1627, %v1952_v53  }
 0x18c   : > { %1629 = vset.pattern.permute.xlu1 %v1737_v21  ;;  %v1409_v21 = vld [vmem:[%s1860_s16 + $0x80] sm:$0xff] }
 0x18d   : > { %1173 = vperm.xlu1 %1629, %v1952_v53  }
 0x191   : > { %1630 = vset.pattern.permute.xlu1 %v1729_v12  ;;  %v1407_v12 = vld [vmem:[%s1860_s16 + $0x70] sm:$0xff] }
 0x192   : > { %1181 = vperm.xlu1 %1630, %v1952_v53  }
 0x1a9   : > { %v950_v22 = vpop.permute.xlu1 %949  ;;  %v935_v23 = vpop.permute.xlu0 %934 }
 0x1aa   : > { %v937_v29 = vmul.f32 %v935_v23, %v931_v24  ;;  %v952_v32 = vmul.f32 %v1395_v26, %v950_v22 }
 0x1ae   : > { %v958_v27 = vpop.permute.xlu1 %957  ;;  %v942_v28 = vpop.permute.xlu0 %941 }
 0x1af   : > { %v944_v30 = vmul.f32 %v1394_v25, %v942_v28  ;;  %v960_v35 = vmul.f32 %v1396_v31, %v958_v27  ;;  %v1410_v25 = vld [vmem:[%s1860_s16 + $0x88] sm:$0xff]  ;;  %v1411_v28 = vld [vmem:[%s1860_s16 + $0x90] sm:$0xff] }
 0x1b1   : > { %v945_v33 = vadd.f32 %v944_v30, %v937_v29 }
 0x1b3   : > { %v953_v36 = vadd.f32 %v952_v32, %v945_v33  ;;  %v966_v37 = vpop.permute.xlu1 %965  ;;  %v974_v41 = vpop.permute.xlu0 %973  ;;  %v1412_v33 = vld [vmem:[%s1860_s16 + $0x98] sm:$0xff] }
 0x1b4   : > { %v968_v38 = vmul.f32 %v1397_v34, %v966_v37  ;;  %v976_v44 = vmul.f32 %v1398_v40, %v974_v41  ;;  %v1413_v37 = vld [vmem:[%s1860_s16 + $0xa0] sm:$0xff]  ;;  %v1414_v40 = vld [vmem:[%s1860_s16 + $0xa8] sm:$0xff] }
 0x1b5   : > { %v961_v39 = vadd.f32 %v960_v35, %v953_v36 }
 0x1b7   : > { %v969_v42 = vadd.f32 %v968_v38, %v961_v39 }
 0x1b8   : > { %v982_v45 = vpop.permute.xlu1 %981  ;;  %v998_v53 = vpop.permute.xlu0 %997 }
 0x1b9   : > { %v977_v46 = vadd.f32 %v976_v44, %v969_v42  ;;  %v984_v47 = vmul.f32 %v1399_v43, %v982_v45  ;;  %v1000_v56 = vmul.f32 %v1401_v52, %v998_v53  ;;  %v1415_v45 = vld [vmem:[%s1860_s16 + $0xb0] sm:$0xff]  ;;  %v1417_v52 = vld [vmem:[%s1860_s16 + $0xc0] sm:$0xff] }
 0x1bb   : > { %v985_v50 = vadd.f32 %v984_v47, %v977_v46 }
 0x1bd   : > { %v990_v49 = vpop.permute.xlu1 %989  ;;  %v1022_v1 = vpop.permute.xlu0 %1021 }
 0x1be   : > { %v992_v51 = vmul.f32 %v1400_v48, %v990_v49  ;;  %v1024_v4 = vmul.f32 %v1404_v0, %v1022_v1  ;;  %v1416_v49 = vld [vmem:[%s1860_s16 + $0xb8] sm:$0xff] }
 0x1bf   : > { %v1420_v0 = vld [vmem:[%s1860_s16 + $0xd8] sm:$0xff] }
 0x1c0   : > { %v993_v54 = vadd.f32 %v992_v51, %v985_v50 }
 0x1c2   : > { %v1006_v57 = vpop.permute.xlu1 %1005  ;;  %v1001_v58 = vadd.f32 %v1000_v56, %v993_v54  ;;  %v1046_v13 = vpop.permute.xlu0 %1045 }
 0x1c3   : > { %v1008_v59 = vmul.f32 %v1402_v55, %v1006_v57  ;;  %v1048_v16 = vmul.f32 %v1407_v12, %v1046_v13  ;;  %v1418_v57 = vld [vmem:[%s1860_s16 + $0xc8] sm:$0xff]  ;;  %v1423_v12 = vld [vmem:[%s1860_s16 + $0xf0] sm:$0xff] }
 0x1c5   : > { %v1009_v62 = vadd.f32 %v1008_v59, %v1001_v58 }
 0x1c7   : > { %v1014_v61 = vpop.permute.xlu1 %1013  ;;  %v1070_v26 = vpop.permute.xlu0 %1069 }
 0x1c8   : > { %v1016_v63 = vmul.f32 %v1403_v60, %v1014_v61  ;;  %v1072_v29 = vmul.f32 %v1410_v25, %v1070_v26  ;;  %v1419_v61 = vld [vmem:[%s1860_s16 + $0xd0] sm:$0xff] }
 0x1ca   : > { %v1017_v2 = vadd.f32 %v1016_v63, %v1009_v62 }
 0x1cc   : > { %v1030_v5 = vpop.permute.xlu1 %1029  ;;  %v1025_v6 = vadd.f32 %v1024_v4, %v1017_v2  ;;  %v1094_v38 = vpop.permute.xlu0 %1093 }
 0x1cd   : > { %v1032_v7 = vmul.f32 %v1405_v3, %v1030_v5  ;;  %v1096_v41 = vmul.f32 %v1413_v37, %v1094_v38  ;;  %v1421_v5 = vld [vmem:[%s1860_s16 + $0xe0] sm:$0xff] }
 0x1cf   : > { %v1033_v10 = vadd.f32 %v1032_v7, %v1025_v6 }
 0x1d1   : > { %v1038_v9 = vpop.permute.xlu1 %1037  ;;  %v1118_v50 = vpop.permute.xlu0 %1117 }
 0x1d2   : > { %v1040_v11 = vmul.f32 %v1406_v8, %v1038_v9  ;;  %v1120_v53 = vmul.f32 %v1416_v49, %v1118_v50  ;;  %v1422_v9 = vld [vmem:[%s1860_s16 + $0xe8] sm:$0xff] }
 0x1d4   : > { %v1041_v14 = vadd.f32 %v1040_v11, %v1033_v10 }
 0x1d6   : > { %v1054_v17 = vpop.permute.xlu1 %1053  ;;  %v1049_v19 = vadd.f32 %v1048_v16, %v1041_v14  ;;  %v1142_v62 = vpop.permute.xlu0 %1141 }
 0x1d7   : > { %v1056_v20 = vmul.f32 %v1408_v15, %v1054_v17  ;;  %v1144_v1 = vmul.f32 %v1419_v61, %v1142_v62  ;;  %v1424_v17 = vld [vmem:[%s1860_s16 + $0xf8] sm:$0xff]  ;;  %s412_s16 = scalar_lea.vmem %s2064_s4, %s1874_s30 }
 0x1d9   : > { %v1057_v23 = vadd.f32 %v1056_v20, %v1049_v19 }
 0x1db   : > { %v1062_v22 = vpop.permute.xlu1 %1061  ;;  %v1166_v10 = vpop.permute.xlu0 %1165 }
 0x1dc   : > { %v1064_v24 = vmul.f32 %v1409_v21, %v1062_v22  ;;  %v1168_v13 = vmul.f32 %v1422_v9, %v1166_v10 }
 0x1de   : > { %v1065_v27 = vadd.f32 %v1064_v24, %v1057_v23 }
 0x1e0   : > { %v1078_v30 = vpop.permute.xlu1 %1077  ;;  %v1073_v31 = vadd.f32 %v1072_v29, %v1065_v27 }
 0x1e1   : > { %v1080_v32 = vmul.f32 %v1411_v28, %v1078_v30  ;;  %v1206_v30 = vld [vmem:[%s404_s22] sm:$0xff] }
 0x1e2   : > { %v1213_v38 = vmul.f32 %v1206_v30, %v1206_v30 }
 0x1e3   : > { %v1081_v35 = vadd.f32 %v1080_v32, %v1073_v31  ;;  %v1210_v31 = vmul.f32 2.0, %v1206_v30 }
 0x1e5   : > { %v1086_v34 = vpop.permute.xlu1 %1085 }
 0x1e6   : > { %v1088_v36 = vmul.f32 %v1412_v33, %v1086_v34  ;;  %v1209_v34 = vld [vmem:[%s416_s15] sm:$0xff] }
 0x1e8   : > { %v1089_v39 = vadd.f32 %v1088_v36, %v1081_v35  ;;  %v1207_v35 = vld [vmem:[%s408_s19] sm:$0xff] }
 0x1ea   : > { %v1102_v42 = vpop.permute.xlu1 %1101  ;;  %v1097_v43 = vadd.f32 %v1096_v41, %v1089_v39  ;;  %v1223_v41 = vsub.f32 1.0, %v1209_v34 }
 0x1eb   : > { %v1104_v44 = vmul.f32 %v1414_v40, %v1102_v42  ;;  %v1217_v40 = vmul.f32 2.0, %v1207_v35 }
 0x1ed   : > { %v1105_v47 = vadd.f32 %v1104_v44, %v1097_v43  ;;  %v1220_v44 = vmul.f32 %v1207_v35, %v1207_v35 }
 0x1ef   : > { %v1110_v46 = vpop.permute.xlu1 %1109 }
 0x1f0   : > { %v1112_v48 = vmul.f32 %v1415_v45, %v1110_v46 }
 0x1f2   : > { %v1113_v51 = vadd.f32 %v1112_v48, %v1105_v47 }
 0x1f4   : > { %v1126_v54 = vpop.permute.xlu1 %1125  ;;  %v1121_v55 = vadd.f32 %v1120_v53, %v1113_v51 }
 0x1f5   : > { %v1128_v56 = vmul.f32 %v1417_v52, %v1126_v54 }
 0x1f7   : > { %v1129_v59 = vadd.f32 %v1128_v56, %v1121_v55 }
 0x1f9   : > { %v1134_v58 = vpop.permute.xlu1 %1133 }
 0x1fa   : > { %v1136_v60 = vmul.f32 %v1418_v57, %v1134_v58 }
 0x1fc   : > { %v1137_v63 = vadd.f32 %v1136_v60, %v1129_v59 }
 0x1fe   : > { %v1150_v2 = vpop.permute.xlu1 %1149  ;;  %v1145_v3 = vadd.f32 %v1144_v1, %v1137_v63 }
 0x1ff   : > { %v1152_v4 = vmul.f32 %v1420_v0, %v1150_v2 }
 0x201   : > { %v1153_v7 = vadd.f32 %v1152_v4, %v1145_v3 }
 0x203   : > { %v1158_v6 = vpop.permute.xlu1 %1157 }
 0x204   : > { %v1160_v8 = vmul.f32 %v1421_v5, %v1158_v6 }
 0x206   : > { %v1161_v11 = vadd.f32 %v1160_v8, %v1153_v7 }
 0x208   : > { %v1174_v14 = vpop.permute.xlu1 %1173  ;;  %v1169_v15 = vadd.f32 %v1168_v13, %v1161_v11  ;;  %v1188_v26 = vpop.xlane.xlu0 %1187 }
 0x209   : > { %v1176_v16 = vmul.f32 %v1423_v12, %v1174_v14  ;;  %v1200_v27 = vsub.f32 128.0, %v1188_v26  ;;  %vm1202_vm2 = vcmp.eq.f32.partialorder %v1188_v26, 0.0  ;;  %v1214_v49 = vmul.f32 %v1213_v38, %v1188_v26 }
 0x20a   : > { %v1203_v28 = vsel %vm1202_vm2, 1.0, %v1188_v26 }
 0x20b   : > { %v1177_v20 = vadd.f32 %v1176_v16, %v1169_v15  ;;  %vm1204_vm3 = vcmp.eq.f32.partialorder %v1200_v27, 0.0  ;;  %1632 = vrcp.f32 %v1203_v28  ;;  %v1221_v54 = vmul.f32 %v1220_v44, %v1200_v27 }
 0x20c   : > { %v1205_v29 = vsel %vm1204_vm3, 1.0, %v1200_v27 }
 0x20d   : > { %v1182_v19 = vpop.permute.xlu1 %1181  ;;  %1634 = vrcp.f32 %v1205_v29 }
 0x20e   : > { %v1184_v21 = vmul.f32 %v1424_v17, %v1182_v19 }
 0x210   : > { %v1185_v22 = vadd.f32 %v1184_v21, %v1177_v20 }
 0x212   : > { %1189 = vadd.xlane.f32.xlu1 %v1185_v22  ;;  %v1191_v23 = vmul.f32 %v1986_v18, %v1185_v22  ;;  %v1194_v24 = vmul.f32 %v1185_v22, %v1185_v22 }
 0x214   : > { %1192 = vadd.xlane.f32.xlu0 %v1191_v23  ;;  %v1197_v25 = vmul.f32 %v1194_v24, %v1986_v18  ;;  %v1208_v18 = vld [vmem:[%s412_s16] sm:$0xff] }
 0x215   : > { %v1231_v33 = vadd.f32 1.0, %v1208_v18 }
 0x216   : > { %1198 = vadd.xlane.f32.xlu1 %v1197_v25 }
 0x217   : > { %v1232_v42 = vmul.f32 2.0, %v1231_v33 }
 0x218   : > { %1195 = vadd.xlane.f32.xlu0 %v1194_v24  ;;  %v1633_v47 = vpop.eup %1632 }
 0x219   : > { %v1233_v48 = vmul.f32 %v1232_v42, %v1209_v34  ;;  %v1237_v53 = vmul.f32 %v1232_v42, %v1223_v41  ;;  %v1225_v56 = vmul.f32 %v1633_v47, %v1223_v41 }
 0x21a   : > { %v1635_v52 = vpop.eup %1634 }
 0x21b   : > { %v1228_v57 = vmul.f32 %v1635_v52, %v1209_v34  ;;  %v1234_v59 = vmul.f32 %v1635_v52, %v1233_v48  ;;  %v1238_v61 = vmul.f32 %v1633_v47, %v1237_v53 }
 0x29b   : > { %v1190_v32 = vpop.xlane.xlu1 %1189 }
 0x29d   : > { %v1193_v36 = vpop.xlane.xlu0 %1192 }
 0x29e   : > { %v1201_v37 = vsub.f32 %v1190_v32, %v1193_v36  ;;  %v1211_v39 = vmul.f32 %v1210_v31, %v1193_v36  ;;  %v1239_v2 = vmul.f32 %v1238_v61, %v1193_v36 }
 0x29f   : > { %v1199_v43 = vpop.xlane.xlu1 %1198 }
 0x2a0   : > { %v1212_v45 = vsub.f32 %v1199_v43, %v1211_v39  ;;  %v1218_v50 = vmul.f32 %v1217_v40, %v1201_v37  ;;  %v1235_v0 = vmul.f32 %v1234_v59, %v1201_v37 }
 0x2a1   : > { %v1196_v46 = vpop.xlane.xlu0 %1195 }
 0x2a2   : > { %v1216_v51 = vsub.f32 %v1196_v46, %v1199_v43  ;;  %v1215_v55 = vadd.f32 %v1214_v49, %v1212_v45 }
 0x2a4   : > { %v1219_v58 = vsub.f32 %v1216_v51, %v1218_v50  ;;  %v1226_v62 = vmul.f32 %v1225_v56, %v1215_v55 }
 0x2a6   : > { %v1222_v60 = vadd.f32 %v1221_v54, %v1219_v58 }
 0x2a8   : > { %v1229_v63 = vmul.f32 %v1228_v57, %v1222_v60 }
 0x2aa   : > { %v1230_v1 = vadd.f32 %v1229_v63, %v1226_v62 }
 0x2ac   : > { %v1236_v3 = vadd.f32 %v1235_v0, %v1230_v1 }
 0x2ae   : > { %v1240_v4 = vsub.f32 %v1236_v3, %v1239_v2 }
 0x2b0   : > { %1242 = vst.msk [vmem:[%s424_s25] sm:$0xff] %vm1241_vm4, %v1240_v4 }
 0x2b1 PF: > { %p18_p8 = scmp.ge.s32.totalorder %s1805_s10, 4   ;;  %s2073_s27 = smov %s1690_s28 }
 0x2b2   : > { %s2074_s28 = smov %s1694_s29  ;;  %s2075_s29 = smov %s1815_s13 }
 0x2b3   : > { %s2076_s30 = smov %s1805_s10  ;;  %20 = sbr.rel (!%p18_p8) target bundleno = 3 (0x3), region = 141 }
 0x2b8   :  { %1262 = vsyncpa [#allocation3], 1 }
 0x2b9   :  { %1264 = vsyncpa [#allocation3 + $0x1], 1 }

</bundles_post_ra>
